<compile_context>
chip_gen: v6e
topology: v6e:2x2x1
jax: 0.10.0
libtpu: 0.0.40
codegen_flags: <defaults>
</compile_context>

<pallas_src>
import functools

import jax
import jax.numpy as jnp
from jax.experimental import pallas as pl
from jax.experimental.pallas import tpu as pltpu


def _round_up(n, m):
    return ((n + m - 1) // m) * m


# ---------------------------------------------------------------------------
# Kernel
# ---------------------------------------------------------------------------
def _pca_gated_mlp_kernel(
    x_ref,       # [B, T]                 f32  (x_enc[..., 0])
    mats_ref,    # [r0+r1+r2, lanes]      f32  packed matrices
    vecs_ref,    # [1, c0+c1+c2]          f32  packed row vectors
    out_ref,     # [B, P]                 f32  de-normalized tail prediction
    *, T, N1, H, P, r0, r1, c0, c1,
):
    x = x_ref[...]                                              # [B, T]

    # --- instance normalization over time ---------------------------------
    means = jnp.mean(x, axis=1, keepdims=True)                  # [B, 1]
    xc = x - means
    # torch.std(unbiased=False) == sqrt(mean((x-mean)^2))
    std = jnp.sqrt(jnp.mean(xc * xc, axis=1, keepdims=True)) + 0.1
    inv_std = pl.reciprocal(std, approx=False)                  # EUP slot
    xn = xc * inv_std - vecs_ref[:, :T]                         # [B, T]

    # --- project onto input PCA basis: einsum('bt,it->bi') ----------------
    proj = jnp.dot(xn, mats_ref[:T, :N1],
                   preferred_element_type=jnp.float32)          # [B, N1]

    # --- Gated_MLP, input+gate fused into one matmul -----------------------
    hg = jnp.dot(proj, mats_ref[r0:r0 + N1, :2 * H],
                 preferred_element_type=jnp.float32) \
        + vecs_ref[:, c0:c0 + 2 * H]                            # [B, 2H]
    h = hg[:, :H] * jax.nn.sigmoid(hg[:, H:])                   # [B, H]

    # --- folded (linear_out @ ioput_pca) restricted to the last P columns --
    y = jnp.dot(h, mats_ref[r0 + r1:r0 + r1 + H, :P],
                preferred_element_type=jnp.float32) \
        + vecs_ref[:, c0 + c1:c0 + c1 + P]                      # [B, P]

    # --- de-normalize -------------------------------------------------------
    out_ref[...] = y * std + means


# ---------------------------------------------------------------------------
# Parameter preparation: fuse, fold, slice tail, pack into 2 slabs
# ---------------------------------------------------------------------------
def pack_params(params, *, pred_len):
    in_mean = params["in_mean"]          # [1, T]
    in_pca_t = params["in_pca_t"]        # [T, N1]   (input_pca.T)
    io_mean = params["io_mean"]          # [1, L]
    io_pca = params["io_pca"]            # [N2, L]
    w_in_t, b_in = params["w_in_t"], params["b_in"]        # [N1,H], [1,H]
    w_gate_t, b_gate = params["w_gate_t"], params["b_gate"]
    w_out_t, b_out = params["w_out_t"], params["b_out"]    # [H,N2], [1,N2]

    T, N1 = in_pca_t.shape
    H = w_in_t.shape[1]
    L = io_pca.shape[1]
    P = pred_len
    hp = jax.lax.Precision.HIGHEST

    # fuse input / gate projections
    w_ig_t = jnp.concatenate([w_in_t, w_gate_t], axis=1)        # [N1, 2H]
    b_ig = jnp.concatenate([b_in, b_gate], axis=1)              # [1, 2H]

    # constant-fold linear_out through the output PCA basis, keep only tail
    w_out_io = jnp.dot(w_out_t, io_pca, precision=hp)[:, L - P:]        # [H, P]
    b_full = (jnp.dot(b_out, io_pca, precision=hp) + io_mean)[:, L - P:]  # [1, P]

    # pack matrices into one slab (rows sublane-aligned, one lane block)
    lanes = _round_up(max(N1, 2 * H, P), 128)
    r0, r1, r2 = _round_up(T, 8), _round_up(N1, 8), _round_up(H, 8)
    mats = jnp.zeros((r0 + r1 + r2, lanes), jnp.float32)
    mats = mats.at[:T, :N1].set(in_pca_t)
    mats = mats.at[r0:r0 + N1, :2 * H].set(w_ig_t)
    mats = mats.at[r0 + r1:r0 + r1 + H, :P].set(w_out_io)

    # pack row vectors into one slab (segments lane-aligned)
    c0, c1, c2 = _round_up(T, 128), _round_up(2 * H, 128), _round_up(P, 128)
    vecs = jnp.zeros((1, c0 + c1 + c2), jnp.float32)
    vecs = vecs.at[:, :T].set(in_mean)
    vecs = vecs.at[:, c0:c0 + 2 * H].set(b_ig)
    vecs = vecs.at[:, c0 + c1:c0 + c1 + P].set(b_full)

    meta = dict(T=T, N1=N1, H=H, P=P, r0=r0, r1=r1, c0=c0, c1=c1)
    return mats, vecs, meta


# ---------------------------------------------------------------------------
# Wrapper
# ---------------------------------------------------------------------------
def pca_linear_forecast(x_enc, mats, vecs, meta):
    """x_enc: [B, T, C] f32.  Returns [B, pred_len, 1] f32."""
    B = x_enc.shape[0]
    P = meta["P"]
    x = x_enc[..., 0]                                           # [B, T] (glue)
    kernel = pl.pallas_call(
        functools.partial(_pca_gated_mlp_kernel, **meta),
        out_shape=jax.ShapeDtypeStruct((B, P), jnp.float32),
        # No grid: three full-array VMEM blocks (x + 2 packed parameter slabs).
        in_specs=[pl.BlockSpec(memory_space=pltpu.VMEM)] * 3,
        out_specs=pl.BlockSpec(memory_space=pltpu.VMEM),
    )
    return kernel(x, mats, vecs)[:, :, None]                    # [B, P, 1]


# ---------------------------------------------------------------------------
# Synthetic parameters matching the module's shapes (the .pt files in the
# original module are replaced by deterministic random stand-ins).
# ---------------------------------------------------------------------------
def make_params(key, *, seq_len, pred_len, N1=30, N2=30):
    H = 2 * N2
    L = seq_len + pred_len
    ks = jax.random.split(key, 10)
    scale = 0.1
    return {
        "in_mean":  scale * jax.random.normal(ks[0], (1, seq_len), jnp.float32),
        "in_pca_t": scale * jax.random.normal(ks[1], (seq_len, N1), jnp.float32),
        "io_mean":  scale * jax.random.normal(ks[2], (1, L), jnp.float32),
        "io_pca":   scale * jax.random.normal(ks[3], (N2, L), jnp.float32),
        "w_in_t":   scale * jax.random.normal(ks[4], (N1, H), jnp.float32),
        "b_in":     scale * jax.random.normal(ks[5], (1, H), jnp.float32),
        "w_gate_t": scale * jax.random.normal(ks[6], (N1, H), jnp.float32),
        "b_gate":   scale * jax.random.normal(ks[7], (1, H), jnp.float32),
        "w_out_t":  scale * jax.random.normal(ks[8], (H, N2), jnp.float32),
        "b_out":    scale * jax.random.normal(ks[9], (1, N2), jnp.float32),
    }


def _reference(x_enc, params, *, pred_len):
    """Pure-JAX reference with the original (un-fused, un-folded) op order."""
    x = x_enc[..., 0]
    means = jnp.mean(x, axis=1, keepdims=True)
    xc = x - means
    std = jnp.sqrt(jnp.mean(xc * xc, axis=1, keepdims=True)) + 0.1
    xn = xc / std - params["in_mean"]
    proj = xn @ params["in_pca_t"]
    h = (proj @ params["w_in_t"] + params["b_in"]) * jax.nn.sigmoid(
        proj @ params["w_gate_t"] + params["b_gate"])
    pred = h @ params["w_out_t"] + params["b_out"]
    full = (pred @ params["io_pca"] + params["io_mean"]) * std + means
    return full[:, -pred_len:, None]


if __name__ == "__main__":
    # Small shapes consistent with the module: N1=N2=30 fixed by __init__;
    # channels only matter through x_enc[..., 0].
    B, seq_len, pred_len, C = 2, 48, 16, 4

    key = jax.random.PRNGKey(0)
    k_x, k_p = jax.random.split(key)
    x_enc = jax.random.normal(k_x, (B, seq_len, C), jnp.float32)
    params = make_params(k_p, seq_len=seq_len, pred_len=pred_len)

    mats, vecs, meta = pack_params(params, pred_len=pred_len)

    forward = jax.jit(lambda xe, m, v: pca_linear_forecast(xe, m, v, meta))
    out = jax.block_until_ready(forward(x_enc, mats, vecs))
    ref = _reference(x_enc, params, pred_len=pred_len)

    assert out.shape == (B, pred_len, 1), out.shape
    assert jnp.allclose(out, ref, atol=1e-4, rtol=1e-4)
    print("KERNEL_OK")
</pallas_src>

<mosaic_0001>
module attributes {stable_mosaic.version = 11 : i64} {
  func.func @_pca_gated_mlp_kernel(%arg0: memref<2x48xf32, #tpu.memory_space<vmem>>, %arg1: memref<144x128xf32, #tpu.memory_space<vmem>>, %arg2: memref<1x384xf32, #tpu.memory_space<vmem>>, %arg3: memref<2x16xf32, #tpu.memory_space<vmem>>) attributes {dimension_semantics = [], scalar_prefetch = 0 : i64, scratch_operands = 0 : i64, tpu.core_type = #tpu.core_type<tc>} {
    %c0 = arith.constant 0 : index
    %c0_0 = arith.constant 0 : index
    %0 = vector.load %arg0[%c0, %c0_0] : memref<2x48xf32, #tpu.memory_space<vmem>>, vector<2x48xf32>
    %cst = arith.constant dense<0.000000e+00> : vector<2xf32>
    %1 = vector.multi_reduction <add>, %0, %cst [1] : vector<2x48xf32> to vector<2xf32>
    %2 = vector.shape_cast %1 : vector<2xf32> to vector<2x1xf32>
    %cst_1 = arith.constant 4.800000e+01 : f32
    %3 = vector.broadcast %cst_1 : f32 to vector<2x1xf32>
    %4 = arith.divf %2, %3 : vector<2x1xf32>
    %5 = vector.broadcast %4 : vector<2x1xf32> to vector<2x48xf32>
    %6 = arith.subf %0, %5 : vector<2x48xf32>
    %7 = arith.mulf %6, %6 : vector<2x48xf32>
    %cst_2 = arith.constant dense<0.000000e+00> : vector<2xf32>
    %8 = vector.multi_reduction <add>, %7, %cst_2 [1] : vector<2x48xf32> to vector<2xf32>
    %9 = vector.shape_cast %8 : vector<2xf32> to vector<2x1xf32>
    %cst_3 = arith.constant 4.800000e+01 : f32
    %10 = vector.broadcast %cst_3 : f32 to vector<2x1xf32>
    %11 = arith.divf %9, %10 : vector<2x1xf32>
    %12 = math.sqrt %11 : vector<2x1xf32>
    %cst_4 = arith.constant 1.000000e-01 : f32
    %13 = vector.broadcast %cst_4 : f32 to vector<2x1xf32>
    %14 = arith.addf %12, %13 : vector<2x1xf32>
    %15 = tpu.reciprocal %14 : vector<2x1xf32> -> vector<2x1xf32>
    %16 = vector.broadcast %15 : vector<2x1xf32> to vector<2x48xf32>
    %17 = arith.mulf %6, %16 : vector<2x48xf32>
    %c0_5 = arith.constant 0 : index
    %c0_6 = arith.constant 0 : index
    %18 = vector.load %arg2[%c0_5, %c0_6] : memref<1x384xf32, #tpu.memory_space<vmem>>, vector<1x48xf32>
    %19 = vector.broadcast %18 : vector<1x48xf32> to vector<2x48xf32>
    %20 = arith.subf %17, %19 : vector<2x48xf32>
    %c0_7 = arith.constant 0 : index
    %c0_8 = arith.constant 0 : index
    %21 = vector.load %arg1[%c0_7, %c0_8] : memref<144x128xf32, #tpu.memory_space<vmem>>, vector<48x30xf32>
    %cst_9 = arith.constant dense<0.000000e+00> : vector<2x30xf32>
    %22 = tpu.matmul %20, %21, %cst_9 {dimension_numbers = #tpu.dot_dimension_numbers<[1], [0], [0], [1], [0, 0, 1, 1], [], []>} : vector<2x48xf32>, vector<48x30xf32>, vector<2x30xf32> -> vector<2x30xf32>
    %c48 = arith.constant 48 : index
    %c0_10 = arith.constant 0 : index
    %23 = vector.load %arg1[%c48, %c0_10] : memref<144x128xf32, #tpu.memory_space<vmem>>, vector<30x120xf32>
    %cst_11 = arith.constant dense<0.000000e+00> : vector<2x120xf32>
    %24 = tpu.matmul %22, %23, %cst_11 {dimension_numbers = #tpu.dot_dimension_numbers<[1], [0], [0], [1], [0, 0, 1, 1], [], []>} : vector<2x30xf32>, vector<30x120xf32>, vector<2x120xf32> -> vector<2x120xf32>
    %c0_12 = arith.constant 0 : index
    %c128 = arith.constant 128 : index
    %25 = vector.load %arg2[%c0_12, %c128] : memref<1x384xf32, #tpu.memory_space<vmem>>, vector<1x120xf32>
    %26 = vector.broadcast %25 : vector<1x120xf32> to vector<2x120xf32>
    %27 = arith.addf %24, %26 : vector<2x120xf32>
    %28 = vector.extract_strided_slice %27 {offsets = [0, 0], sizes = [2, 60], strides = [1, 1]} : vector<2x120xf32> to vector<2x60xf32>
    %29 = vector.extract_strided_slice %27 {offsets = [0, 60], sizes = [2, 60], strides = [1, 1]} : vector<2x120xf32> to vector<2x60xf32>
    %30 = arith.negf %29 : vector<2x60xf32>
    %31 = math.exp %30 : vector<2x60xf32>
    %cst_13 = arith.constant 1.000000e+00 : f32
    %32 = vector.broadcast %cst_13 : f32 to vector<2x60xf32>
    %33 = arith.addf %32, %31 : vector<2x60xf32>
    %34 = arith.divf %32, %33 : vector<2x60xf32>
    %35 = arith.mulf %28, %34 : vector<2x60xf32>
    %c80 = arith.constant 80 : index
    %c0_14 = arith.constant 0 : index
    %36 = vector.load %arg1[%c80, %c0_14] : memref<144x128xf32, #tpu.memory_space<vmem>>, vector<60x16xf32>
    %cst_15 = arith.constant dense<0.000000e+00> : vector<2x16xf32>
    %37 = tpu.matmul %35, %36, %cst_15 {dimension_numbers = #tpu.dot_dimension_numbers<[1], [0], [0], [1], [0, 0, 1, 1], [], []>} : vector<2x60xf32>, vector<60x16xf32>, vector<2x16xf32> -> vector<2x16xf32>
    %c0_16 = arith.constant 0 : index
    %c256 = arith.constant 256 : index
    %38 = vector.load %arg2[%c0_16, %c256] : memref<1x384xf32, #tpu.memory_space<vmem>>, vector<1x16xf32>
    %39 = vector.broadcast %38 : vector<1x16xf32> to vector<2x16xf32>
    %40 = arith.addf %37, %39 : vector<2x16xf32>
    %41 = vector.broadcast %14 : vector<2x1xf32> to vector<2x16xf32>
    %42 = arith.mulf %40, %41 : vector<2x16xf32>
    %43 = vector.broadcast %4 : vector<2x1xf32> to vector<2x16xf32>
    %44 = arith.addf %42, %43 : vector<2x16xf32>
    %c0_17 = arith.constant 0 : index
    %c0_18 = arith.constant 0 : index
    %45 = vector.load %arg3[%c0_17, %c0_18] : memref<2x16xf32, #tpu.memory_space<vmem>>, vector<2x16xf32>
    tpu.vector_store %arg3[%c0_17, %c0_18], %44 {strides = array<i32>} : memref<2x16xf32, #tpu.memory_space<vmem>>, vector<2x16xf32>,
    return
  }
}

</mosaic_0001>

<bundles_post_ra>
// kernel: _lambda_.1
= control target key start
LH: loop header
LB: loop body
LE: loop exit
PB: predicated region body
PF: predicated region fallthrough
CT: control target
= control target key end

     0   :  { %8 = vsyncpa [#allocation3], 0  ;;  %s563_s0 = inlined_call_operand.vmem [shape: f32[2,48], index: 0, kind: input, shape index: {}]   ;;  %s564_s1 = inlined_call_operand.hbm [shape: f32[144,128], index: 1, kind: input, shape index: {}]   ;;  %s565_s2 = inlined_call_operand.vmem [shape: f32[1,384], index: 2, kind: input, shape index: {}]   ;;  %s566_s3 = inlined_call_operand.hbm [shape: f32[2,16], index: 3, kind: output, shape index: {}]  }
   0x1   :  { %9 = vsyncpa [#allocation4], 0  ;;  %s486_s12 = smov [#allocation2]  }
   0x2   :  { %s17_s13 = sshll.u32 %s486_s12, 4  ;;  %s18_s13 = int_to_ptr.vmem [resolvable:$true] %s17_s13 }
   0x3   :  { %s450_s14 = scalar_lea.vmem %s18_s13, 2304  ;;  %p455_p1 = scmp.lt.s32.totalorder %s18_s13, %s18_s13 }
   0x4   :  { %p451_p0 = scmp.ne.s32.totalorder %s18_s13, %s450_s14  ;;  %p456_p2 = scmp.lt.s32.totalorder %s450_s14, %s450_s14 }
   0x6   :  { %p457_p3 = por %p456_p2, %p455_p1 }
   0x8   :  { %p458_p4 = pnand %p457_p3, %p451_p0 }
   0xa   :  { %461 = shalt.err (!%p458_p4)
}
   0xb   :  { %s487_s15 = smov 128   ;;  %s488_s16 = smov 8  }
   0xc   :  { %23 = dma.hbm_to_vmem [thread:$0]  %s564_s1, 2304, %s18_s13, [#allocation3], %s487_s15, %s487_s15, %s488_s16  }
   0xd   :  { %482 = dma.done.wait [#allocation3], 2304  }
   0xe   :  { %483 = vsyncadd [#allocation3], 4294964992  ;;  %vm30_vm0 = vcmask 386048   ;;  %v29_v0 = vld [vmem:[%s563_s0] sm:$0x3]  ;;  %v65_v7 = vld [vmem:[#allocation2 + $0x28] sm:$0xff] }
   0xf   :  { %v31_v1 = vsel %vm30_vm0, %v29_v0, 0.0  ;;  %v489_v8 = vmov 0.0   ;;  %v64_v9 = vld [vmem:[#allocation2 + $0x20] sm:$0xff]  ;;  %vm490_vm1 = vmmov 0   ;;  %v63_v10 = vld [vmem:[#allocation2 + $0x18] sm:$0xff]  ;;  %v62_v11 = vld [vmem:[#allocation2 + $0x10] sm:$0xff] }
  0x10   :  { %32 = vadd.xlane.f32.xlu0 %v31_v1  ;;  %382 = vmatprep.subr.mxu0 %v489_v8  ;;  %v61_v12 = vld [vmem:[#allocation2 + $0x8] sm:$0xff]  ;;  %v60_v13 = vld [vmem:[#allocation2] sm:$0xff]  ;;  %vm66_vm4 = vcmask 392192   ;;  %vm155_vm5 = vcmask 1045504   ;;  %v141_v28 = vld [vmem:[#allocation2 + $0x38] sm:$0xff]  ;;  %vm151_vm6 = vcmask 244736  }
  0x11   :  { %394 = vmatprep.mubr.msk.f32.mxu0 %vm490_vm1, %v489_v8  ;;  %383 = vmatpush3.msra.mxu0 %v65_v7  ;;  %v352_v23 = vld [vmem:[%s565_s2] ss:$0 sm:$0xff]  ;;  %v143_v26 = vld [vmem:[#allocation2 + $0x48] sm:$0x3f]  ;;  %v140_v29 = vld [vmem:[#allocation2 + $0x30] sm:$0xff]  ;;  %vm259_vm7 = vcmask 1043456  }
  0x12   :  { %408 = vmatprep.subr.mxu1 %v489_v8  ;;  %384 = vmatprep.subr.mxu0 %v489_v8  ;;  %v142_v27 = vld [vmem:[#allocation2 + $0x40] sm:$0xff]  ;;  %v247_v32 = vld [vmem:[#allocation2 + $0x88] sm:$0xf]  ;;  %v245_v34 = vld [vmem:[#allocation2 + $0x78] sm:$0xff]  ;;  %s491_s23 = smov 68   ;;  %vm255_vm8 = vcmask 490496  }
  0x13   :  { %424 = vmatprep.mubr.msk.f32.mxu1 %vm490_vm1, %v489_v8  ;;  %385 = vmatpush3.msra.mxu0 %v64_v9  ;;  %v246_v33 = vld [vmem:[#allocation2 + $0x80] sm:$0xff]  ;;  %v244_v35 = vld [vmem:[#allocation2 + $0x70] sm:$0xff]  ;;  %v243_v36 = vld [vmem:[#allocation2 + $0x68] sm:$0xff]  ;;  %s492_s26 = smov [#allocation5]   ;;  %vm335_vm9 = vcmask 123904  }
  0x14   :  { %386 = vmatprep.subr.mxu0 %v489_v8  ;;  %409 = vmatpush3.msk.msra.mxu1 %vm259_vm7, %v247_v32  ;;  %v242_v37 = vld [vmem:[#allocation2 + $0x60] sm:$0xff]  ;;  %v241_v38 = vld [vmem:[#allocation2 + $0x58] sm:$0xff]  ;;  %v240_v46 = vld [vmem:[#allocation2 + $0x50] sm:$0xff]  ;;  %s343_s27 = sshll.u32 %s492_s26, 4  ;;  %s344_s27 = int_to_ptr.vmem [resolvable:$true] %s343_s27 }
  0x15   :  { %387 = vmatpush3.msra.mxu0 %v63_v10  ;;  %410 = vmatprep.subr.mxu1 %v489_v8  ;;  %v354_v39 = vld [vmem:[%s565_s2 + $0x1] ss:$0 sm:$0xff]  ;;  %v358_v50 = vld [vmem:[%s565_s2 + $0x2] ss:$0 sm:$0xff]  ;;  %s462_s28 = scalar_lea.vmem %s344_s27, 32  ;;  %p467_p6 = scmp.lt.s32.totalorder %s344_s27, %s344_s27 }
  0x16   :  { %388 = vmatprep.subr.mxu0 %v489_v8  ;;  %411 = vmatpush3.msra.mxu1 %v246_v33  ;;  %p463_p5 = scmp.ne.s32.totalorder %s344_s27, %s462_s28  ;;  %p468_p7 = scmp.lt.s32.totalorder %s462_s28, %s462_s28 }
  0x17   :  { %389 = vmatpush3.msra.mxu0 %v62_v11  ;;  %412 = vmatprep.subr.mxu1 %v489_v8 }
  0x18   :  { %390 = vmatprep.subr.mxu0 %v489_v8  ;;  %413 = vmatpush3.msra.mxu1 %v245_v34  ;;  %p469_p8 = por %p468_p7, %p467_p6 }
  0x19   :  { %391 = vmatpush3.msra.mxu0 %v61_v12  ;;  %414 = vmatprep.subr.mxu1 %v489_v8 }
  0x1a   :  { %392 = vmatprep.subr.mxu0 %v489_v8  ;;  %415 = vmatpush3.msra.mxu1 %v244_v35  ;;  %p470_p9 = pnand %p469_p8, %p463_p5 }
  0x1b   :  { %393 = vmatpush3.msra.mxu0 %v60_v13  ;;  %416 = vmatprep.subr.mxu1 %v489_v8 }
  0x1c   :  { %397 = vmatprep.subr.mxu0 %v489_v8  ;;  %417 = vmatpush3.msra.mxu1 %v243_v36 }
  0x1d   :  { %418 = vmatprep.subr.mxu1 %v489_v8 }
  0x1e   :  { %419 = vmatpush3.msra.mxu1 %v242_v37 }
  0x1f   :  { %420 = vmatprep.subr.mxu1 %v489_v8 }
  0x20   :  { %421 = vmatpush3.msra.mxu1 %v241_v38 }
  0x21   :  { %422 = vmatprep.subr.mxu1 %v489_v8 }
  0x22   :  { %423 = vmatpush3.msra.mxu1 %v240_v46 }
  0x99   :  { %v33_v2 = vpop.xlane.xlu0 %32 }
  0x9a   :  { %v519_v3 = vmul.f32 0.020833334, %v33_v2 }
  0x9c   :  { %v36_v4 = vsub.f32 %v29_v0, %v519_v3 }
  0x9e   :  { %v37_v5 = vmul.f32 %v36_v4, %v36_v4 }
  0xa0   :  { %v38_v6 = vsel %vm30_vm0, %v37_v5, 0.0 }
  0xa1   :  { %39 = vadd.xlane.f32.xlu0 %v38_v6 }
 0x12a   :  { %v40_v14 = vpop.xlane.xlu0 %39 }
 0x12b   :  { %v41_v15 = vmul.f32 0.020833334, %v40_v14 }
 0x12d   :  { %434 = vrsqrt.f32 %v41_v15  ;;  %vm44_vm2 = vcmp.eq.f32.partialorder %v41_v15, inf  ;;  %v47_v18 = vand.u32 2147483648, %v41_v15  ;;  %vm46_vm3 = vcmp.eq.f32.partialorder %v41_v15, 0.0 }
 0x13a   :  { %v435_v16 = vpop.eup %434 }
 0x13b   :  { %v43_v17 = vmul.f32 %v435_v16, %v41_v15 }
 0x13d   :  { %v45_v19 = vsel %vm44_vm2, %v41_v15, %v43_v17 }
 0x13e   :  { %v48_v20 = vsel %vm46_vm3, %v47_v18, %v45_v19 }
 0x13f   :  { %v534_v21 = vadd.f32 0.1, %v48_v20 }
 0x141   :  { %436 = vrcp.f32 %v534_v21 }
 0x14e   :  { %v437_v22 = vpop.eup %436 }
 0x14f   :  { %v51_v24 = vmul.f32 %v437_v22, %v36_v4 }
 0x151   :  { %v59_v25 = vsub.f32 %v51_v24, %v352_v23 }
 0x153   :  { %395 = vmatmul.mubr.msk.f32.vlgmr.msra.gmra.mxu0 %vm66_vm4, %v59_v25 }
 0x154   :  { %398 = vmatpush3.msk.msra.mxu0 %vm155_vm5, %v143_v26  ;;  %405 = vmatprep.mubr.msk.f32.mxu0 %vm490_vm1, %v489_v8 }
 0x155   :  { %399 = vmatprep.subr.mxu0 %v489_v8 }
 0x156   :  { %400 = vmatpush3.msra.mxu0 %v142_v27 }
 0x157   :  { %401 = vmatprep.subr.mxu0 %v489_v8 }
 0x158   :  { %402 = vmatpush3.msra.mxu0 %v141_v28 }
 0x159   :  { %403 = vmatprep.subr.mxu0 %v489_v8 }
 0x15a   :  { %404 = vmatpush3.msra.mxu0 %v140_v29 }
 0x213   :  { %v136_v30 = vpop.f32.mrf.mxu0 }
 0x214   :  { %406 = vmatmul.mubr.msk.f32.vlgmr.msra.gmra.mxu0 %vm151_vm6, %v136_v30 }
 0x215   :  { %v396_v31 = vpop.f32.mrf.mxu0 }
 0x2d4   :  { %v225_v40 = vpop.f32.mrf.mxu0 }
 0x2d5   :  { %v226_v41 = vadd.f32 %v354_v39, %v225_v40 }
 0x2d6   :  { %v407_v42 = vpop.f32.mrf.mxu0 }
 0x2d7   :  { %v357_v43 = vmul.f32 -1.442695, %v226_v41 }
 0x2d9   :  { %438 = vpow2.f32 %v357_v43 }
 0x2e6   :  { %v439_v44 = vpop.eup %438 }
 0x2e7   :  { %v232_v45 = vadd.f32 1.0, %v439_v44 }
 0x2e9   :  { %440 = vrcp.f32 %v232_v45 }
 0x2f6   :  { %v441_v47 = vpop.eup %440 }
 0x2f7   :  { %236 = vrot.lane.b32.xlu1 %v441_v47, %s491_s23 }
 0x369   :  { %v237_v48 = vpop.permute.xlu1 %236 }
 0x36a   :  { %v239_v49 = vmul.f32 %v237_v48, %v226_v41 }
 0x36c   :  { %425 = vmatmul.mubr.msk.f32.vlgmr.msra.gmra.mxu1 %vm255_vm8, %v239_v49 }
 0x42c   :  { %v329_v51 = vpop.f32.mrf.mxu1 }
 0x42d   :  { %v330_v52 = vadd.f32 %v358_v50, %v329_v51 }
 0x42e   :  { %v426_v53 = vpop.f32.mrf.mxu1 }
 0x42f   :  { %v333_v54 = vmul.f32 %v330_v52, %v534_v21 }
 0x431   :  { %v334_v55 = vadd.f32 %v333_v54, %v519_v3 }
 0x433   :  { %336 = vst.msk [vmem:[#allocation5] sm:$0x3] %vm335_vm9, %v334_v55 }
 0x434   :  { %473 = shalt.err (!%p470_p9)
}
 0x435   :  { %346 = dma.vmem_to_hbm [thread:$0]  %s344_s27, 32, %s566_s3, [#allocation4]  }
 0x436   :  { %484 = dma.done.wait [#allocation4], 32  }
 0x437   :  { %485 = vsyncadd [#allocation4], 4294967264 }
 0x438   :  { %350 = vsyncpa [#allocation3], 1 }
 0x439   :  { %351 = vsyncpa [#allocation4], 1 }

</bundles_post_ra>
